<compile_context>
chip_gen: v7x
topology: tpu7x:2x2x1
jax: 0.10.0
libtpu: 0.0.40
codegen_flags: <defaults>
</compile_context>

<pallas_src>
import jax
import jax.numpy as jnp
from jax import lax
from jax.experimental import pallas as pl
from jax.experimental.pallas import tpu as pltpu

EPS = 1e-5  # PyTorch InstanceNorm2d default eps


def _roll_lanes(x, shift, hw):
    """out[:, j] = x[:, (j - shift) mod hw] along the lane (last) axis."""
    shift = shift % hw
    if shift == 0:
        return x
    if hw % 128 == 0:
        # XLU lane rotation (separate issue slot from the VPU/MXU work).
        return pltpu.roll(x, shift, axis=1)
    # Fallback for lane extents that are not a multiple of 128 (never hit in
    # the tests or at production CycleGAN shapes): correct, but lowers to a
    # sliced concatenation with relayout copies.
    return jnp.concatenate([x[:, hw - shift:], x[:, :hw - shift]], axis=1)


def _col_index(lane, w):
    """Column index (lane mod W) of every flattened-HW lane position."""
    if w & (w - 1) == 0:
        return jnp.bitwise_and(lane, w - 1)  # power-of-two W: plain VPU bit op
    # TODO(synk): non-power-of-two W relies on vector integer remainder.
    return lane % w


def _make_resnet_block_kernel(H, W, C):
    HW = H * W
    inv_hw = 1.0 / float(HW)

    def instance_norm(y):
        # Two-pass stats: mean, then variance of the centred values.  The
        # centred tensor is needed for the output anyway, so this is no more
        # expensive than E[y^2]-E[y]^2 and avoids catastrophic cancellation.
        mean = jnp.sum(y, axis=1, keepdims=True) * inv_hw
        d = y - mean
        var = jnp.sum(d * d, axis=1, keepdims=True) * inv_hw
        return d * lax.rsqrt(var + EPS)

    def kernel(x_ref, w1_ref, b1_ref, w2_ref, b2_ref, o_ref):
        # Boundary masks, built once from an in-kernel iota and reused by both
        # convolutions (replaces the old lane-padded (HW, 1) col-id input).
        lane = lax.broadcasted_iota(jnp.int32, (1, HW), 1)
        col = _col_index(lane, W)
        col_first = col == 0                 # w == 0
        col_last = col == W - 1              # w == W-1
        row_first = lane < W                 # h == 0
        row_last = lane >= (H - 1) * W       # h == H-1

        def shift_down(a):
            # out[(h,w)] = a[(h-1,w)] for h >= 1;  reflect: out[(0,w)] = a[(1,w)]
            return jnp.where(row_first, _roll_lanes(a, HW - W, HW),
                             _roll_lanes(a, W, HW))

        def shift_up(a):
            # out[(h,w)] = a[(h+1,w)] for h <= H-2;  reflect: out[(H-1,w)] = a[(H-2,w)]
            return jnp.where(row_last, _roll_lanes(a, W, HW),
                             _roll_lanes(a, HW - W, HW))

        def conv3x3(src, w_ref, b_ref):
            """conv3x3(reflect_pad(src)) + bias.  src: (C, HW) f32 -> (C, HW) f32."""
            # Column neighbours: two lane rolls shared by both sides.
            left = _roll_lanes(src, 1, HW)        # left[(h,w)]  = src[(h,w-1)]
            right = _roll_lanes(src, HW - 1, HW)  # right[(h,w)] = src[(h,w+1)]
            s_m1 = jnp.where(col_first, right, left)   # reflect: x[h,-1] = x[h,1]
            s_p1 = jnp.where(col_last, left, right)    # reflect: x[h,W] = x[h,W-2]

            # Fold the dw taps into the matmul contraction: (3C, HW) patches.
            p = jnp.concatenate(
                [s_m1.astype(jnp.bfloat16), src.astype(jnp.bfloat16),
                 s_p1.astype(jnp.bfloat16)], axis=0)

            # Three (C, 3C) @ (3C, HW) bf16 matmuls (one per dh), f32 acc.
            # Shift-and-accumulate eagerly so only one dh partial is live at a
            # time; weight ref is sliced per dh (no full-weight materialize).
            a0 = jnp.dot(w_ref[0], p, preferred_element_type=jnp.float32)
            acc = shift_down(a0)                                     # dh = 0
            acc = acc + b_ref[...]                                   # bias (C,1)
            acc = acc + jnp.dot(w_ref[1], p,
                                preferred_element_type=jnp.float32)  # dh = 1
            a2 = jnp.dot(w_ref[2], p, preferred_element_type=jnp.float32)
            return acc + shift_up(a2)                                # dh = 2

        # First half: reflect pad -> conv3x3 -> instance norm -> relu.
        y = conv3x3(x_ref[0], w1_ref, b1_ref)
        y = jnp.maximum(instance_norm(y), 0.0)
        # TODO(synk): use_dropout=True (nn.Dropout(0.5)) and the affine /
        # replicate / zero-pad module variants are not emitted; this is the
        # standard reflect + InstanceNorm2d(affine=False) + no-dropout config.

        # Second half: reflect pad -> conv3x3 -> instance norm.
        y = instance_norm(conv3x3(y, w2_ref, b2_ref))

        # Skip connection.  Re-read x_ref here so the first load's live range
        # ends after conv1 instead of spanning the whole kernel.
        o_ref[0] = x_ref[0] + y

    return kernel


def _vmem_limit_bytes(C, HW):
    """Generation-aware scoped-VMEM request computed from actual buffer needs."""
    io_block = C * HW * 4                               # one f32 (C, HW) block
    w_bytes = 2 * (3 * C * 3 * C * 2 + C * 4)           # bf16 weights + f32 bias, both convs
    pipelined = 2 * (2 * io_block) + 2 * w_bytes        # double-buffered x/out + weights
    # Conv live set: bf16 patch (3C, HW) + ~5 concurrent f32 (C, HW) values.
    live = 3 * C * HW * 2 + 5 * C * HW * 4
    need = int(1.25 * (pipelined + live))               # 25% headroom for spills/scratch
    try:
        phys = getattr(pltpu.get_tpu_info(), "vmem_capacity_bytes", 64 * 2**20)
    except Exception:
        phys = 64 * 2**20                               # assume smallest (v7x) VMEM/TC
    # Never request more than 7/8 of physical VMEM (leave compiler headroom).
    return min(max(need, 32 * 2**20), (7 * phys) // 8)


def resnet_block(x_nchw, w1, b1, w2, b2):
    """x_nchw: (N,C,H,W) f32; w*: (3,3,Cin,Cout); b*: (C,).  Returns (N,C,H,W) f32."""
    N, C, H, W = x_nchw.shape
    assert H >= 2 and W >= 2, "ReflectionPad2d(1) needs spatial dims >= 2"
    HW = H * W

    # NCHW -> (N, C, H*W): pure reshape, no transpose / extra HBM round trip.
    x = x_nchw.reshape(N, C, HW)

    # (3, 3, Cin, Cout) -> (3, Cout, 3*Cin): each dh slice is the (C, 3C)
    # matmul LHS whose columns match the [s_m1 ; x ; s_p1] patch row order.
    def prep_w(w):
        return (jnp.transpose(w, (0, 3, 1, 2))
                .reshape(3, C, 3 * C).astype(jnp.bfloat16))

    w1k, w2k = prep_w(w1), prep_w(w2)
    b1k = jnp.asarray(b1, jnp.float32).reshape(C, 1)
    b2k = jnp.asarray(b2, jnp.float32).reshape(C, 1)

    kernel = _make_resnet_block_kernel(H, W, C)

    cost = pl.CostEstimate(
        flops=2 * 2 * N * HW * 9 * C * C,        # two 3x3 convs, 2 flops/MAC
        transcendentals=2 * N * C,               # one rsqrt per (conv, n, c)
        bytes_accessed=(2 * N * HW * C * 4       # x in + out (f32)
                        + 2 * 9 * C * C * 2      # bf16 weights
                        + 2 * C * 4))            # biases

    io_spec = pl.BlockSpec((1, C, HW), lambda n: (n, 0, 0))
    # Weights/biases use a constant index_map, so they are DMA'd once and then
    # revisited (not re-fetched) on every grid step.
    # TODO(synk): single-buffering these constants (pipeline_mode=pl.Buffered(1))
    # would return ~2.3 MiB of VMEM at C=256; left at the default buffering.
    w_spec = pl.BlockSpec((3, C, 3 * C), lambda n: (0, 0, 0))
    b_spec = pl.BlockSpec((C, 1), lambda n: (0, 0))

    # TODO(synk): for production CycleGAN shapes (H=W=64, C=256) on v7x
    # (64 MiB VMEM/TC) with N==1, add an H-strip grid axis (8-16 rows with a
    # 1-row halo, marked "parallel") and split each instance norm into a
    # per-strip stats pass plus a finalize pass (3 strip-pipelined passes that
    # stream the conv1/conv2 outputs through HBM).  The whole-image block used
    # here fits v5e/v6e comfortably and fits v7x only thanks to the reduced
    # live set (dw-folded matmuls + eager shift-accumulate).
    out = pl.pallas_call(
        kernel,
        out_shape=jax.ShapeDtypeStruct((N, C, HW), jnp.float32),
        grid=(N,),
        in_specs=[io_spec, w_spec, b_spec, w_spec, b_spec],
        out_specs=io_spec,
        compiler_params=pltpu.CompilerParams(
            # Batch elements are independent -> megacore sharding on v7x.
            dimension_semantics=("parallel",),
            vmem_limit_bytes=_vmem_limit_bytes(C, HW),
        ),
        cost_estimate=cost,
    )(x, w1k, b1k, w2k, b2k)

    return out.reshape(N, C, H, W)


def ref_forward(x_nchw, w1, b1, w2, b2):
    """Pure-JAX reference (bf16 matmul operands, f32 accumulation, like the kernel)."""
    def conv(x, w, b):
        xp = jnp.pad(x, ((0, 0), (1, 1), (1, 1), (0, 0)), mode="reflect")
        y = lax.conv_general_dilated(
            xp.astype(jnp.bfloat16), w.astype(jnp.bfloat16), (1, 1), "VALID",
            dimension_numbers=("NHWC", "HWIO", "NHWC"),
            preferred_element_type=jnp.float32)
        return y + b.reshape(1, 1, 1, -1)

    def inorm(y):
        m = jnp.mean(y, axis=(1, 2), keepdims=True)
        v = jnp.mean((y - m) ** 2, axis=(1, 2), keepdims=True)
        return (y - m) * lax.rsqrt(v + EPS)

    x = jnp.transpose(x_nchw, (0, 2, 3, 1))
    y = jnp.maximum(inorm(conv(x, w1, b1)), 0.0)
    y = inorm(conv(y, w2, b2))
    return jnp.transpose(x + y, (0, 3, 1, 2))


def _check(N, C, H, W, key):
    kx, kw1, kb1, kw2, kb2 = jax.random.split(key, 5)
    x = jax.random.normal(kx, (N, C, H, W), jnp.float32)
    w1 = 0.1 * jax.random.normal(kw1, (3, 3, C, C), jnp.float32)
    b1 = 0.1 * jax.random.normal(kb1, (C,), jnp.float32)
    w2 = 0.1 * jax.random.normal(kw2, (3, 3, C, C), jnp.float32)
    b2 = 0.1 * jax.random.normal(kb2, (C,), jnp.float32)

    out = jax.block_until_ready(resnet_block(x, w1, b1, w2, b2))
    ref = jax.block_until_ready(ref_forward(x, w1, b1, w2, b2))

    assert out.shape == (N, C, H, W), out.shape
    max_err = float(jnp.max(jnp.abs(out - ref)))
    assert jnp.allclose(out, ref, atol=5e-3, rtol=5e-3), max_err


if __name__ == "__main__":
    key = jax.random.PRNGKey(0)
    k1, k2 = jax.random.split(key)
    # Small-C config from the spec example (lane-dense output despite C=4).
    _check(N=2, C=4, H=16, W=16, key=k1)
    # Wide-C config (multi-vreg lane rolls + 3C-deep matmul contraction).
    _check(N=1, C=128, H=16, W=16, key=k2)
    print("KERNEL_OK")
</pallas_src>

<mosaic_0001>
module attributes {stable_mosaic.version = 11 : i64} {
  func.func @kernel(%arg0: i32, %arg1: memref<1x4x256xf32, #tpu.memory_space<vmem>>, %arg2: memref<3x4x12xbf16, #tpu.memory_space<vmem>>, %arg3: memref<4x1xf32, #tpu.memory_space<vmem>>, %arg4: memref<3x4x12xbf16, #tpu.memory_space<vmem>>, %arg5: memref<4x1xf32, #tpu.memory_space<vmem>>, %arg6: memref<1x4x256xf32, #tpu.memory_space<vmem>>) attributes {dimension_semantics = [#tpu.dimension_semantics<parallel>], iteration_bounds = array<i64: 2>, scalar_prefetch = 0 : i64, scratch_operands = 0 : i64, tpu.core_type = #tpu.core_type<tc>, window_params = [{transform_indices = @transform_0, window_bounds = array<i64: 1, 4, 256>}, {pipeline_mode = #tpu.pipeline_mode<synchronous>, transform_indices = @transform_1, window_bounds = array<i64: 3, 4, 12>}, {pipeline_mode = #tpu.pipeline_mode<synchronous>, transform_indices = @transform_2, window_bounds = array<i64: 4, 1>}, {pipeline_mode = #tpu.pipeline_mode<synchronous>, transform_indices = @transform_3, window_bounds = array<i64: 3, 4, 12>}, {pipeline_mode = #tpu.pipeline_mode<synchronous>, transform_indices = @transform_4, window_bounds = array<i64: 4, 1>}, {transform_indices = @transform_5, window_bounds = array<i64: 1, 4, 256>}]} {
    %0 = tpu.iota {dimensions = array<i32: 1>} : vector<1x256xi32>
    %c15_i32 = arith.constant 15 : i32
    %1 = vector.broadcast %c15_i32 : i32 to vector<1x256xi32>
    %2 = arith.andi %0, %1 : vector<1x256xi32>
    %c0_i32 = arith.constant 0 : i32
    %3 = vector.broadcast %c0_i32 : i32 to vector<1x256xi32>
    %4 = arith.cmpi eq, %2, %3 : vector<1x256xi32>
    %c15_i32_0 = arith.constant 15 : i32
    %5 = vector.broadcast %c15_i32_0 : i32 to vector<1x256xi32>
    %6 = arith.cmpi eq, %2, %5 : vector<1x256xi32>
    %c16_i32 = arith.constant 16 : i32
    %7 = vector.broadcast %c16_i32 : i32 to vector<1x256xi32>
    %8 = arith.cmpi slt, %0, %7 : vector<1x256xi32>
    %c240_i32 = arith.constant 240 : i32
    %9 = vector.broadcast %c240_i32 : i32 to vector<1x256xi32>
    %10 = arith.cmpi sge, %0, %9 : vector<1x256xi32>
    %c0 = arith.constant 0 : index
    %c0_1 = arith.constant 0 : index
    %c0_2 = arith.constant 0 : index
    %11 = vector.load %arg1[%c0, %c0_1, %c0_2] : memref<1x4x256xf32, #tpu.memory_space<vmem>>, vector<1x4x256xf32>
    %12 = vector.shape_cast %11 : vector<1x4x256xf32> to vector<4x256xf32>
    %c1_i32 = arith.constant 1 : i32
    %13 = tpu.dynamic_rotate %12 by %c1_i32 dim 1 : vector<4x256xf32>, i32 -> vector<4x256xf32>
    %c255_i32 = arith.constant 255 : i32
    %14 = tpu.dynamic_rotate %12 by %c255_i32 dim 1 : vector<4x256xf32>, i32 -> vector<4x256xf32>
    %15 = vector.shape_cast %4 : vector<1x256xi1> to vector<1x256xi1>
    %16 = vector.broadcast %15 : vector<1x256xi1> to vector<4x256xi1>
    %17 = arith.select %16, %14, %13 : vector<4x256xi1>, vector<4x256xf32>
    %18 = vector.shape_cast %6 : vector<1x256xi1> to vector<1x256xi1>
    %19 = vector.broadcast %18 : vector<1x256xi1> to vector<4x256xi1>
    %20 = arith.select %19, %13, %14 : vector<4x256xi1>, vector<4x256xf32>
    %21 = arith.truncf %17 : vector<4x256xf32> to vector<4x256xbf16>
    %22 = arith.truncf %12 : vector<4x256xf32> to vector<4x256xbf16>
    %23 = arith.truncf %20 : vector<4x256xf32> to vector<4x256xbf16>
    %24 = tpu.concatenate %21, %22, %23 in 0 : vector<4x256xbf16>, vector<4x256xbf16>, vector<4x256xbf16> -> vector<12x256xbf16>
    %c0_3 = arith.constant 0 : index
    %c0_4 = arith.constant 0 : index
    %c0_5 = arith.constant 0 : index
    %25 = vector.load %arg2[%c0_3, %c0_4, %c0_5] : memref<3x4x12xbf16, #tpu.memory_space<vmem>>, vector<1x4x12xbf16>
    %26 = vector.shape_cast %25 : vector<1x4x12xbf16> to vector<4x12xbf16>
    %cst = arith.constant dense<0.000000e+00> : vector<4x256xf32>
    %27 = tpu.matmul %26, %24, %cst {dimension_numbers = #tpu.dot_dimension_numbers<[1], [0], [0], [1], [0, 0, 1, 1], [], []>} : vector<4x12xbf16>, vector<12x256xbf16>, vector<4x256xf32> -> vector<4x256xf32>
    %c240_i32_6 = arith.constant 240 : i32
    %28 = tpu.dynamic_rotate %27 by %c240_i32_6 dim 1 : vector<4x256xf32>, i32 -> vector<4x256xf32>
    %c16_i32_7 = arith.constant 16 : i32
    %29 = tpu.dynamic_rotate %27 by %c16_i32_7 dim 1 : vector<4x256xf32>, i32 -> vector<4x256xf32>
    %30 = vector.shape_cast %8 : vector<1x256xi1> to vector<1x256xi1>
    %31 = vector.broadcast %30 : vector<1x256xi1> to vector<4x256xi1>
    %32 = arith.select %31, %28, %29 : vector<4x256xi1>, vector<4x256xf32>
    %c0_8 = arith.constant 0 : index
    %c0_9 = arith.constant 0 : index
    %33 = vector.load %arg3[%c0_8, %c0_9] : memref<4x1xf32, #tpu.memory_space<vmem>>, vector<4x1xf32>
    %34 = vector.broadcast %33 : vector<4x1xf32> to vector<4x256xf32>
    %35 = arith.addf %32, %34 : vector<4x256xf32>
    %c1 = arith.constant 1 : index
    %c0_10 = arith.constant 0 : index
    %c0_11 = arith.constant 0 : index
    %36 = vector.load %arg2[%c1, %c0_10, %c0_11] : memref<3x4x12xbf16, #tpu.memory_space<vmem>>, vector<1x4x12xbf16>
    %37 = vector.shape_cast %36 : vector<1x4x12xbf16> to vector<4x12xbf16>
    %cst_12 = arith.constant dense<0.000000e+00> : vector<4x256xf32>
    %38 = tpu.matmul %37, %24, %cst_12 {dimension_numbers = #tpu.dot_dimension_numbers<[1], [0], [0], [1], [0, 0, 1, 1], [], []>} : vector<4x12xbf16>, vector<12x256xbf16>, vector<4x256xf32> -> vector<4x256xf32>
    %39 = arith.addf %35, %38 : vector<4x256xf32>
    %c2 = arith.constant 2 : index
    %c0_13 = arith.constant 0 : index
    %c0_14 = arith.constant 0 : index
    %40 = vector.load %arg2[%c2, %c0_13, %c0_14] : memref<3x4x12xbf16, #tpu.memory_space<vmem>>, vector<1x4x12xbf16>
    %41 = vector.shape_cast %40 : vector<1x4x12xbf16> to vector<4x12xbf16>
    %cst_15 = arith.constant dense<0.000000e+00> : vector<4x256xf32>
    %42 = tpu.matmul %41, %24, %cst_15 {dimension_numbers = #tpu.dot_dimension_numbers<[1], [0], [0], [1], [0, 0, 1, 1], [], []>} : vector<4x12xbf16>, vector<12x256xbf16>, vector<4x256xf32> -> vector<4x256xf32>
    %c16_i32_16 = arith.constant 16 : i32
    %43 = tpu.dynamic_rotate %42 by %c16_i32_16 dim 1 : vector<4x256xf32>, i32 -> vector<4x256xf32>
    %c240_i32_17 = arith.constant 240 : i32
    %44 = tpu.dynamic_rotate %42 by %c240_i32_17 dim 1 : vector<4x256xf32>, i32 -> vector<4x256xf32>
    %45 = vector.shape_cast %10 : vector<1x256xi1> to vector<1x256xi1>
    %46 = vector.broadcast %45 : vector<1x256xi1> to vector<4x256xi1>
    %47 = arith.select %46, %43, %44 : vector<4x256xi1>, vector<4x256xf32>
    %48 = arith.addf %39, %47 : vector<4x256xf32>
    %cst_18 = arith.constant dense<0.000000e+00> : vector<4xf32>
    %49 = vector.multi_reduction <add>, %48, %cst_18 [1] : vector<4x256xf32> to vector<4xf32>
    %50 = vector.shape_cast %49 : vector<4xf32> to vector<4x1xf32>
    %cst_19 = arith.constant 3.906250e-03 : f32
    %51 = vector.broadcast %cst_19 : f32 to vector<4x1xf32>
    %52 = arith.mulf %50, %51 : vector<4x1xf32>
    %53 = vector.broadcast %52 : vector<4x1xf32> to vector<4x256xf32>
    %54 = arith.subf %48, %53 : vector<4x256xf32>
    %55 = arith.mulf %54, %54 : vector<4x256xf32>
    %cst_20 = arith.constant dense<0.000000e+00> : vector<4xf32>
    %56 = vector.multi_reduction <add>, %55, %cst_20 [1] : vector<4x256xf32> to vector<4xf32>
    %57 = vector.shape_cast %56 : vector<4xf32> to vector<4x1xf32>
    %cst_21 = arith.constant 3.906250e-03 : f32
    %58 = vector.broadcast %cst_21 : f32 to vector<4x1xf32>
    %59 = arith.mulf %57, %58 : vector<4x1xf32>
    %cst_22 = arith.constant 9.99999974E-6 : f32
    %60 = vector.broadcast %cst_22 : f32 to vector<4x1xf32>
    %61 = arith.addf %59, %60 : vector<4x1xf32>
    %62 = math.rsqrt %61 : vector<4x1xf32>
    %63 = vector.broadcast %62 : vector<4x1xf32> to vector<4x256xf32>
    %64 = arith.mulf %54, %63 : vector<4x256xf32>
    %cst_23 = arith.constant 0.000000e+00 : f32
    %65 = vector.broadcast %cst_23 : f32 to vector<4x256xf32>
    %66 = arith.maximumf %64, %65 : vector<4x256xf32>
    %c1_i32_24 = arith.constant 1 : i32
    %67 = tpu.dynamic_rotate %66 by %c1_i32_24 dim 1 : vector<4x256xf32>, i32 -> vector<4x256xf32>
    %c255_i32_25 = arith.constant 255 : i32
    %68 = tpu.dynamic_rotate %66 by %c255_i32_25 dim 1 : vector<4x256xf32>, i32 -> vector<4x256xf32>
    %69 = vector.shape_cast %4 : vector<1x256xi1> to vector<1x256xi1>
    %70 = vector.broadcast %69 : vector<1x256xi1> to vector<4x256xi1>
    %71 = arith.select %70, %68, %67 : vector<4x256xi1>, vector<4x256xf32>
    %72 = vector.shape_cast %6 : vector<1x256xi1> to vector<1x256xi1>
    %73 = vector.broadcast %72 : vector<1x256xi1> to vector<4x256xi1>
    %74 = arith.select %73, %67, %68 : vector<4x256xi1>, vector<4x256xf32>
    %75 = arith.truncf %71 : vector<4x256xf32> to vector<4x256xbf16>
    %76 = arith.truncf %66 : vector<4x256xf32> to vector<4x256xbf16>
    %77 = arith.truncf %74 : vector<4x256xf32> to vector<4x256xbf16>
    %78 = tpu.concatenate %75, %76, %77 in 0 : vector<4x256xbf16>, vector<4x256xbf16>, vector<4x256xbf16> -> vector<12x256xbf16>
    %c0_26 = arith.constant 0 : index
    %c0_27 = arith.constant 0 : index
    %c0_28 = arith.constant 0 : index
    %79 = vector.load %arg4[%c0_26, %c0_27, %c0_28] : memref<3x4x12xbf16, #tpu.memory_space<vmem>>, vector<1x4x12xbf16>
    %80 = vector.shape_cast %79 : vector<1x4x12xbf16> to vector<4x12xbf16>
    %cst_29 = arith.constant dense<0.000000e+00> : vector<4x256xf32>
    %81 = tpu.matmul %80, %78, %cst_29 {dimension_numbers = #tpu.dot_dimension_numbers<[1], [0], [0], [1], [0, 0, 1, 1], [], []>} : vector<4x12xbf16>, vector<12x256xbf16>, vector<4x256xf32> -> vector<4x256xf32>
    %c240_i32_30 = arith.constant 240 : i32
    %82 = tpu.dynamic_rotate %81 by %c240_i32_30 dim 1 : vector<4x256xf32>, i32 -> vector<4x256xf32>
    %c16_i32_31 = arith.constant 16 : i32
    %83 = tpu.dynamic_rotate %81 by %c16_i32_31 dim 1 : vector<4x256xf32>, i32 -> vector<4x256xf32>
    %84 = vector.shape_cast %8 : vector<1x256xi1> to vector<1x256xi1>
    %85 = vector.broadcast %84 : vector<1x256xi1> to vector<4x256xi1>
    %86 = arith.select %85, %82, %83 : vector<4x256xi1>, vector<4x256xf32>
    %c0_32 = arith.constant 0 : index
    %c0_33 = arith.constant 0 : index
    %87 = vector.load %arg5[%c0_32, %c0_33] : memref<4x1xf32, #tpu.memory_space<vmem>>, vector<4x1xf32>
    %88 = vector.broadcast %87 : vector<4x1xf32> to vector<4x256xf32>
    %89 = arith.addf %86, %88 : vector<4x256xf32>
    %c1_34 = arith.constant 1 : index
    %c0_35 = arith.constant 0 : index
    %c0_36 = arith.constant 0 : index
    %90 = vector.load %arg4[%c1_34, %c0_35, %c0_36] : memref<3x4x12xbf16, #tpu.memory_space<vmem>>, vector<1x4x12xbf16>
    %91 = vector.shape_cast %90 : vector<1x4x12xbf16> to vector<4x12xbf16>
    %cst_37 = arith.constant dense<0.000000e+00> : vector<4x256xf32>
    %92 = tpu.matmul %91, %78, %cst_37 {dimension_numbers = #tpu.dot_dimension_numbers<[1], [0], [0], [1], [0, 0, 1, 1], [], []>} : vector<4x12xbf16>, vector<12x256xbf16>, vector<4x256xf32> -> vector<4x256xf32>
    %93 = arith.addf %89, %92 : vector<4x256xf32>
    %c2_38 = arith.constant 2 : index
    %c0_39 = arith.constant 0 : index
    %c0_40 = arith.constant 0 : index
    %94 = vector.load %arg4[%c2_38, %c0_39, %c0_40] : memref<3x4x12xbf16, #tpu.memory_space<vmem>>, vector<1x4x12xbf16>
    %95 = vector.shape_cast %94 : vector<1x4x12xbf16> to vector<4x12xbf16>
    %cst_41 = arith.constant dense<0.000000e+00> : vector<4x256xf32>
    %96 = tpu.matmul %95, %78, %cst_41 {dimension_numbers = #tpu.dot_dimension_numbers<[1], [0], [0], [1], [0, 0, 1, 1], [], []>} : vector<4x12xbf16>, vector<12x256xbf16>, vector<4x256xf32> -> vector<4x256xf32>
    %c16_i32_42 = arith.constant 16 : i32
    %97 = tpu.dynamic_rotate %96 by %c16_i32_42 dim 1 : vector<4x256xf32>, i32 -> vector<4x256xf32>
    %c240_i32_43 = arith.constant 240 : i32
    %98 = tpu.dynamic_rotate %96 by %c240_i32_43 dim 1 : vector<4x256xf32>, i32 -> vector<4x256xf32>
    %99 = vector.shape_cast %10 : vector<1x256xi1> to vector<1x256xi1>
    %100 = vector.broadcast %99 : vector<1x256xi1> to vector<4x256xi1>
    %101 = arith.select %100, %97, %98 : vector<4x256xi1>, vector<4x256xf32>
    %102 = arith.addf %93, %101 : vector<4x256xf32>
    %cst_44 = arith.constant dense<0.000000e+00> : vector<4xf32>
    %103 = vector.multi_reduction <add>, %102, %cst_44 [1] : vector<4x256xf32> to vector<4xf32>
    %104 = vector.shape_cast %103 : vector<4xf32> to vector<4x1xf32>
    %cst_45 = arith.constant 3.906250e-03 : f32
    %105 = vector.broadcast %cst_45 : f32 to vector<4x1xf32>
    %106 = arith.mulf %104, %105 : vector<4x1xf32>
    %107 = vector.broadcast %106 : vector<4x1xf32> to vector<4x256xf32>
    %108 = arith.subf %102, %107 : vector<4x256xf32>
    %109 = arith.mulf %108, %108 : vector<4x256xf32>
    %cst_46 = arith.constant dense<0.000000e+00> : vector<4xf32>
    %110 = vector.multi_reduction <add>, %109, %cst_46 [1] : vector<4x256xf32> to vector<4xf32>
    %111 = vector.shape_cast %110 : vector<4xf32> to vector<4x1xf32>
    %cst_47 = arith.constant 3.906250e-03 : f32
    %112 = vector.broadcast %cst_47 : f32 to vector<4x1xf32>
    %113 = arith.mulf %111, %112 : vector<4x1xf32>
    %cst_48 = arith.constant 9.99999974E-6 : f32
    %114 = vector.broadcast %cst_48 : f32 to vector<4x1xf32>
    %115 = arith.addf %113, %114 : vector<4x1xf32>
    %116 = math.rsqrt %115 : vector<4x1xf32>
    %117 = vector.broadcast %116 : vector<4x1xf32> to vector<4x256xf32>
    %118 = arith.mulf %108, %117 : vector<4x256xf32>
    %c0_49 = arith.constant 0 : index
    %c0_50 = arith.constant 0 : index
    %c0_51 = arith.constant 0 : index
    %119 = vector.load %arg1[%c0_49, %c0_50, %c0_51] : memref<1x4x256xf32, #tpu.memory_space<vmem>>, vector<1x4x256xf32>
    %120 = vector.shape_cast %119 : vector<1x4x256xf32> to vector<4x256xf32>
    %121 = arith.addf %120, %118 : vector<4x256xf32>
    %c0_52 = arith.constant 0 : index
    %c0_53 = arith.constant 0 : index
    %c0_54 = arith.constant 0 : index
    %122 = vector.load %arg6[%c0_52, %c0_53, %c0_54] : memref<1x4x256xf32, #tpu.memory_space<vmem>>, vector<1x4x256xf32>
    %123 = vector.shape_cast %122 : vector<1x4x256xf32> to vector<4x256xf32>
    %124 = vector.shape_cast %121 : vector<4x256xf32> to vector<1x4x256xf32>
    tpu.vector_store %arg6[%c0_52, %c0_53, %c0_54], %124 {strides = array<i32>} : memref<1x4x256xf32, #tpu.memory_space<vmem>>, vector<1x4x256xf32>,
    return
  }
  func.func @transform_0(%arg0: i32) -> (i32, i32, i32) {
    %c0_i32 = arith.constant 0 : i32
    %c0_i32_0 = arith.constant 0 : i32
    %c0_i32_1 = arith.constant 0 : i32
    return %arg0, %c0_i32, %c0_i32_0 : i32, i32, i32
  }
  func.func @transform_1(%arg0: i32) -> (i32, i32, i32) {
    %c0_i32 = arith.constant 0 : i32
    %c0_i32_0 = arith.constant 0 : i32
    %c0_i32_1 = arith.constant 0 : i32
    %c0_i32_2 = arith.constant 0 : i32
    return %c0_i32, %c0_i32_0, %c0_i32_1 : i32, i32, i32
  }
  func.func @transform_2(%arg0: i32) -> (i32, i32) {
    %c0_i32 = arith.constant 0 : i32
    %c0_i32_0 = arith.constant 0 : i32
    %c0_i32_1 = arith.constant 0 : i32
    return %c0_i32, %c0_i32_0 : i32, i32
  }
  func.func @transform_3(%arg0: i32) -> (i32, i32, i32) {
    %c0_i32 = arith.constant 0 : i32
    %c0_i32_0 = arith.constant 0 : i32
    %c0_i32_1 = arith.constant 0 : i32
    %c0_i32_2 = arith.constant 0 : i32
    return %c0_i32, %c0_i32_0, %c0_i32_1 : i32, i32, i32
  }
  func.func @transform_4(%arg0: i32) -> (i32, i32) {
    %c0_i32 = arith.constant 0 : i32
    %c0_i32_0 = arith.constant 0 : i32
    %c0_i32_1 = arith.constant 0 : i32
    return %c0_i32, %c0_i32_0 : i32, i32
  }
  func.func @transform_5(%arg0: i32) -> (i32, i32, i32) {
    %c0_i32 = arith.constant 0 : i32
    %c0_i32_0 = arith.constant 0 : i32
    %c0_i32_1 = arith.constant 0 : i32
    return %arg0, %c0_i32, %c0_i32_0 : i32, i32, i32
  }
}

</mosaic_0001>

<bundles_post_ra>
// kernel: tpu_custom_call.1
= control target key start
LH: loop header
LB: loop body
LE: loop exit
PB: predicated region body
PF: predicated region fallthrough
CT: control target
= control target key end

     0   :  { %10 = vsyncpa [#allocation3], 0  ;;  %s1449_s0 = inlined_call_operand.hbm [shape: f32[2,4,256], index: 0, kind: input, shape index: {}]   ;;  %s1450_s1 = inlined_call_operand.vmem [shape: bf16[3,4,12], index: 1, kind: input, shape index: {}]   ;;  %s1451_s2 = inlined_call_operand.vmem [shape: f32[4,1], index: 2, kind: input, shape index: {}]   ;;  %s1452_s3 = inlined_call_operand.vmem [shape: bf16[3,4,12], index: 3, kind: input, shape index: {}]   ;;  %s1453_s4 = inlined_call_operand.vmem [shape: f32[4,1], index: 4, kind: input, shape index: {}]   ;;  %s1454_s5 = inlined_call_operand.hbm [shape: f32[2,4,256], index: 5, kind: output, shape index: {}]  }
   0x1   :  { %12 = vsyncpa [#allocation3 + $0x1], 0 }
   0x2   :  { %13 = vsyncpa [#allocation4], 0 }
   0x3   :  { %15 = vsyncpa [#allocation4 + $0x1], 0  ;;  %s1102_s18 = smov 0   ;;  %s1104_s19 = smov 0  }
   0x4   :  { %s1106_s20 = smov 0   ;;  %s1108_s21 = smov 0  }
   0x5 LB: > { %s1123_s22 = sadd.s32 4294967295, %s1063_s21   ;;  %s857_s23 = sadd.s32 4294967294, %s1063_s21   ;;  %s1063_s21 = sphi %s1108_s21, %s1477_s21   ;;  %s1059_s20 = sphi %s1106_s20, %s1476_s20   ;;  %s1055_s19 = sphi %s1104_s19, %s1475_s19   ;;  %s1051_s18 = sphi %s1102_s18, %s1474_s18  }
   0x6   : > { %s1127_s24 = sadd.s32 1, %s1063_s21   ;;  %s28_s25 = sadd.s32 1, %s1059_s20 }
   0x7   : > { %s25_s26 = ssub.s32 %s1063_s21, %s1127_s24  ;;  %p35_p0 = scmp.ne.s32.totalorder %s1059_s20, %s1055_s19 }
   0x8   : > { %p26_p1 = scmp.eq.s32.totalorder %s25_s26, 0  ;;  %p36_p2 = scmp.eq.s32.totalorder %s1063_s21, 0 }
   0x9   : > { %p41_p3 = scmp.ne.s32.totalorder %s1055_s19, %s1051_s18  ;;  %p42_p4 = scmp.eq.s32.totalorder %s1123_s22, 0 }
   0xa   : > { %s1139_s27 = scalar_select %p26_p1, %s1059_s20, %s28_s25  }
   0xb   : > { %p1141_p5 = por %p36_p2, %p35_p0  ;;  %p1145_p6 = por %p42_p4, %p41_p3 }
   0xc   : > { %p149_p7 = scmp.eq.s32.totalorder %s1123_s22, 1  ;;  %p155_p8 = scmp.eq.s32.totalorder %s857_s23, 1 }
   0xd   : > { %p901_p10 = scmp.lt.s32.totalorder %s1063_s21, 2  ;;  %s187_s7 = sand.u32 1, %s1059_s20  }
   0xe   : > { %p1152_p11 = por %p149_p7, %p35_p0  ;;  %p1156_p12 = por %p155_p8, %p41_p3 }
   0xf   : > { %s887_s8 = sshll.u32 %s1063_s21, 7  ;;  %s860_s9 = sshll.u32 %s187_s7, 3 }
  0x10   : > { %s1458_s30 = scalar_select %p1152_p11, 1, 0 }
  0x11   : > { %s1459_s6 = scalar_select %p1156_p12, 1, 0 }
  0x12   : > { %s1165_s12 = scalar_lea.hbm %s1449_s0, %s887_s8  ;;  %s191_s13 = scalar_lea.vmem [#allocation2], %s860_s9 }
  0x13   : > { %s199_s14 = sshll.u32 %s191_s13, 4  ;;  %p1169_p13 = pnand %p901_p10, %p1141_p5  ;;  %s1173_s14 = int_to_ptr.vmem [resolvable:$true] %s199_s14 }
  0x14   : > { %s188_s16 = scalar_lea.sflag [#allocation3], %s187_s7  ;;  %s967_s17 = scalar_lea.hbm %s1165_s12, 128 }
  0x15   : > { %p968_p2 = scmp.ne.s32.totalorder %s1165_s12, %s967_s17  ;;  %p969_p3 = pneg %p1169_p13 }
  0x16   : > { %s972_s26 = scalar_lea.hbm %s1449_s0, 256  ;;  %p973_p5 = scmp.lt.u32.totalorder %s1165_s12, %s1449_s0 }
  0x17   : > { %p970_p4 = pnand %p969_p3, %p968_p2  ;;  %p974_p8 = scmp.lt.u32.totalorder %s972_s26, %s967_s17 }
  0x18   : > { %p976_p9 = scmp.lt.u32.totalorder %s967_s17, %s1165_s12 }
  0x19   : > { %p971_p7 = pneg %p970_p4  ;;  %p975_p10 = por %p974_p8, %p973_p5 }
  0x1b   : > { %p977_p0 = por %p976_p9, %p975_p10 }
  0x1d   : > { %p978_p1 = pnand %p977_p0, %p971_p7 }
  0x1f   : > { %981 = shalt.err (!%p978_p1)
}
  0x20   : > { %s982_s7 = scalar_lea.vmem %s1173_s14, 128  ;;  %s1065_s9 = smov [#allocation2]  }
  0x21   : > { %p983_p2 = scmp.ne.s32.totalorder %s1173_s14, %s982_s7  ;;  %s987_s10 = sshll.u32 %s1065_s9, 4  ;;  %s988_s10 = int_to_ptr.vmem [resolvable:$false] %s987_s10 }
  0x22   : > { %s989_s11 = scalar_lea.vmem %s988_s10, 256  ;;  %p990_p11 = scmp.lt.s32.totalorder %s1173_s14, %s988_s10 }
  0x23   : > { %p985_p4 = pnand %p983_p2, %p969_p3  ;;  %p991_p5 = scmp.lt.s32.totalorder %s989_s11, %s982_s7 }
  0x25   : > { %p986_p12 = pneg %p985_p4  ;;  %p992_p8 = por %p991_p5, %p990_p11 }
  0x27   : > { %p993_p9 = pnand %p992_p8, %p986_p12 }
  0x29   : > { %996 = shalt.err (!%p993_p9)
}
  0x2a   : > { %896 = dma.hbm_to_vmem [thread:$0]  (!%p1169_p13), %s1165_s12, 128, %s1173_s14, %s188_s16  }
  0x2b   : > { %p1461_p0 = scmp.lt.s32.totalorder %s1063_s21, 3  ;;  %p1462_p1 = scmp.ge.s32.totalorder %s1063_s21, 1 }
  0x2d   : > { %p205_p3 = pnand %p1462_p1, %p1461_p0 }
  0x2e   : > { %s1207_s13 = sand.u32 (!%p205_p3), 1, %s1055_s19  }
  0x2f   : > { %208 = sbr.rel (%p205_p3) target bundleno = 1656 (0x678), region = 40  ;;  %s864_s17 = sshll.u32 (!%p205_p3), %s1207_s13, 3 }
  0x30   : > { %s211_s23 = scalar_lea.sflag (!%p205_p3), [#allocation3], %s1207_s13  ;;  %s214_s15 = scalar_lea.vmem (!%p205_p3), [#allocation2], %s864_s17 }
  0x36   : > { %1042 = dma.done.wait (%p1145_p6), %s211_s23, 128  }
  0x37   : > { %1044 = vsyncadd (%p1145_p6), %s211_s23, 4294967168  ;;  %v1217_v0 = vld [vmem:[%s214_s15] sm:$0xff]  ;;  %s1066_s12 = smov 1   ;;  %v1067_v3 = vmov 0   ;;  %s1068_s14 = smov 127   ;;  %v242_v5 = vlaneseq  ;;  %vm299_vm6 = vcmask 1041408  }
  0x38   : > { %v257_v1 = vcombine.high %v1217_v0, %v1217_v0  ;;  %353 = vmatprep.mubr.bf16.mxu0 %v1067_v3  ;;  %426 = vmatprep.mubr.bf16.mxu1 %v1067_v3  ;;  %v381_v4 = vld [vmem:[%s1451_s2] sm:$0xf]  ;;  %v287_v12 = vpack.c.bf16 %v1217_v0, %v1217_v0  ;;  %vm306_vm7 = vcmask 1043456   ;;  %vm316_vm8 = vcmask 1045504   ;;  %v871_v45 = vld [vmem:[%s1450_s1 + $0x4] sm:$0x3] }
  0x39   : > { %950 = vset.pattern.permute.xlu1 %v1067_v3  ;;  %961 = vset.pattern.permute.xlu0 %v1067_v3  ;;  %v1231_v6 = vand.u32 127, %v242_v5  ;;  %v311_v43 = vld [vmem:[%s1450_s1] sm:$0x3]  ;;  %vm312_vm9 = vcmask 97280   ;;  %v868_v44 = vld [vmem:[%s1450_s1 + $0x2] sm:$0x3] }
  0x3a   : > { %v940_v2 = vpack.i.bf16 %v257_v1, %v1217_v0  ;;  %384 = vperm.xlu1 %950, %v381_v4   ;;  %v288_v11 = vpack.c.bf16 %v257_v1, %v257_v1  ;;  %v293_v23 = vrot.slane %v287_v12, 6  ;;  %s1069_s10 = smov 112   ;;  %s1070_s11 = smov 16   ;;  %v565_v21 = vld [vmem:[%s1452_s3] sm:$0x3] }
  0x3b   : > { %v1234_v7 = vadd.s32 128, %v1231_v6  ;;  %v245_v9 = vand.u32 15, %v1231_v6  ;;  %vm263_vm0 = vcmp.lt.s32.totalorder %v1231_v6, 1  ;;  %vm270_vm2 = vcmp.lt.s32.totalorder %v1231_v6, 127  ;;  %s888_s28 = sshll.u32 %s1123_s22, 7  ;;  %s240_s8 = scalar_lea.vmem [#allocation5], %s864_s17 }
  0x3c   : > { %941 = vrot.lane.b32.xlu0 %v940_v2, %s1066_s12  ;;  %v294_v22 = vrot.slane %v288_v11, 6  ;;  %vm366_vm10 = vcmp.lt.s32.totalorder %v1231_v6, 112  ;;  %vm251_vm11 = vcmp.lt.s32.totalorder %v1231_v6, 16  ;;  %s787_s7 = sshll.u32 %s240_s8, 4  ;;  %s773_s23 = scalar_lea.sflag [#allocation4], %s1207_s13  ;;  %s1407_s7 = int_to_ptr.vmem [resolvable:$true] %s787_s7 }
  0x3d   : > { %v246_v10 = vand.u32 15, %v1234_v7  ;;  %vm1241_vm1 = vcmp.eq.s32.totalorder %v245_v9, 0  ;;  %vm1246_vm3 = vcmp.eq.s32.totalorder %v245_v9, 15  ;;  %vm254_vm12 = vcmp.ge.s32.totalorder %v1234_v7, 240  ;;  %s997_s15 = scalar_lea.vmem %s1407_s7, 128  ;;  %p1471_p11 = scmp.ne.s32.totalorder %s1458_s30, 0 }
  0x3e   : > { %p998_p6 = scmp.ne.s32.totalorder %s1407_s7, %s997_s15  ;;  %s1071_s22 = smov [#allocation5]  }
  0x3f   : > { %vm1250_vm4 = vcmp.eq.s32.totalorder %v246_v10, 0  ;;  %vm1254_vm5 = vcmp.eq.s32.totalorder %v246_v10, 15  ;;  %s1001_s17 = sshll.u32 %s1071_s22, 4  ;;  %s1002_s17 = int_to_ptr.vmem [resolvable:$false] %s1001_s17 }
  0x40   : > { %946 = vrot.lane.b32.xlu0 %v940_v2, %s1068_s14  ;;  %p999_p12 = pnand %p998_p6, %p1471_p11  ;;  %p1004_p7 = scmp.lt.s32.totalorder %s1407_s7, %s1002_s17 }
  0x42   : > { %p1000_p13 = pneg %p999_p12 }
  0xae   : > { %v942_v8 = vpop.permute.xlu0 %941 }
  0xaf   : > { %v944_v13 = vunpack.i.h.bf16 %v942_v8  ;;  %v943_v14 = vunpack.i.l.bf16 %v942_v8 }
  0xb1   : > { %v264_v24 = vsel %vm263_vm0, %v943_v14, %v944_v13  ;;  %v265_v25 = vsel %vm263_vm0, %v944_v13, %v943_v14 }
  0xb2   : > { %v947_v16 = vpop.permute.xlu0 %946 }
  0xb3   : > { %v949_v19 = vunpack.i.h.bf16 %v947_v16  ;;  %v948_v20 = vunpack.i.l.bf16 %v947_v16 }
  0xb5   : > { %v271_v26 = vsel %vm270_vm2, %v948_v20, %v949_v19  ;;  %v272_v27 = vsel %vm270_vm2, %v949_v19, %v948_v20 }
  0xb6   : > { %v277_v28 = vsel %vm1241_vm1, %v271_v26, %v265_v25  ;;  %v278_v29 = vsel %vm1250_vm4, %v272_v27, %v264_v24  ;;  %v284_v30 = vsel %vm1254_vm5, %v264_v24, %v272_v27  ;;  %v283_v31 = vsel %vm1246_vm3, %v265_v25, %v271_v26 }
  0xb7   : > { %v285_v32 = vpack.c.bf16 %v277_v28, %v277_v28  ;;  %v286_v33 = vpack.c.bf16 %v278_v29, %v278_v29  ;;  %v290_v34 = vpack.c.bf16 %v284_v30, %v284_v30  ;;  %v289_v35 = vpack.c.bf16 %v283_v31, %v283_v31 }
  0xb9   : > { %v298_v36 = vrot.slane %v290_v34, 4  ;;  %v305_v37 = vsel %vm299_vm6, %v286_v33, %v294_v22  ;;  %v297_v38 = vrot.slane %v289_v35, 4  ;;  %v302_v39 = vsel %vm299_vm6, %v285_v32, %v293_v23  ;;  %v385_v58 = vpop.permute.xlu1 %384 }
  0xbb   : > { %v310_v40 = vsel %vm306_vm7, %v305_v37, %v298_v36  ;;  %v308_v41 = vsel %vm306_vm7, %v302_v39, %v297_v38 }
  0xbc   : > { %866 = vmatprep.subr.msk.bf16.mxu0 %vm316_vm8, %v310_v40  ;;  %869 = vmatprep.subr.msk.bf16.mxu1 %vm316_vm8, %v310_v40  ;;  %v317_v42 = vsel %vm316_vm8, %v308_v41, 0 }
  0xbd   : > { %322 = vmatpush1.bf16.msra.mxu0 %v317_v42  ;;  %395 = vmatpush1.bf16.msra.mxu1 %v317_v42 }
  0xbe   : > { %872 = vmatprep.subr.msk.bf16.mxu0 %vm316_vm8, %v310_v40 }
  0xc0   : > { %867 = vmatmul.mubr.msk.bf16.vlgmr.msra.gmra.mrb[0].mxu0 %vm312_vm9, %v311_v43  ;;  %870 = vmatmul.mubr.msk.bf16.vlgmr.msra.gmra.mrb[0].mxu1 %vm312_vm9, %v868_v44 }
  0xc1   : > { %443 = vmatpush1.bf16.msra.mxu0 %v317_v42  ;;  %474 = vmatprep.mubr.bf16.mxu0 %v1067_v3 }
  0xc2   : > { %605 = vmatprep.mubr.bf16.mxu1 %v1067_v3 }
  0xc8   : > { %873 = vmatmul.mubr.msk.bf16.vlgmr.msra.gmra.mrb[4].mxu0 %vm312_vm9, %v871_v45 }
  0xc9   : > { %673 = vmatprep.mubr.bf16.mxu0 %v1067_v3 }
 0x193   : > { %v355_v46 = vpop.f32.mrb[0].mxu0  ;;  %v428_v47 = vpop.f32.mrb[0].mxu1 }
 0x194   : > { %362 = vrot.lane.b32.xlu1 %v355_v46, %s1069_s10  ;;  %v357_v48 = vpop.f32.mrb[1].mxu0  ;;  %v430_v49 = vpop.f32.mrb[1].mxu1 }
 0x195   : > { %364 = vrot.lane.b32.xlu0 %v357_v48, %s1069_s10  ;;  %v359_v50 = vpop.f32.mrb[2].mxu0  ;;  %v432_v51 = vpop.f32.mrb[2].mxu1 }
 0x196   : > { %v360_v52 = vpop.f32.mrb[3].mxu0  ;;  %v433_v53 = vpop.f32.mrb[3].mxu1 }
 0x198   : > { %369 = vrot.lane.b32.xlu1 %v355_v46, %s1070_s11  ;;  %v628_v46 = vld [vmem:[%s1453_s4] sm:$0xf] }
 0x199   : > { %371 = vrot.lane.b32.xlu0 %v357_v48, %s1070_s11 }
 0x19b   : > { %v476_v54 = vpop.f32.mrb[4].mxu0 }
 0x19c   : > { %483 = vrot.lane.b32.xlu1 %v476_v54, %s1070_s11  ;;  %v478_v55 = vpop.f32.mrb[5].mxu0 }
 0x19d   : > { %485 = vrot.lane.b32.xlu0 %v478_v55, %s1070_s11  ;;  %v480_v56 = vpop.f32.mrb[6].mxu0 }
 0x19e   : > { %v481_v57 = vpop.f32.mrb[7].mxu0 }
 0x1a0   : > { %489 = vrot.lane.b32.xlu1 %v476_v54, %s1069_s10 }
 0x1a1   : > { %491 = vrot.lane.b32.xlu0 %v478_v55, %s1069_s10 }
 0x206   : > { %v363_v59 = vpop.permute.xlu1 %362 }
 0x207   : > { %v365_v60 = vpop.permute.xlu0 %364 }
 0x208   : > { %v367_v63 = vsel %vm366_vm10, %v363_v59, %v365_v60 }
 0x20a   : > { %v370_v61 = vpop.permute.xlu1 %369 }
 0x20b   : > { %v372_v62 = vpop.permute.xlu0 %371 }
 0x20c   : > { %v374_v1 = vsel %vm251_vm11, %v372_v62, %v370_v61  ;;  %v373_v2 = vsel %vm251_vm11, %v370_v61, %v372_v62 }
 0x20d   : > { %v379_v4 = vsel %vm251_vm11, %v367_v63, %v374_v1  ;;  %v388_v10 = vadd.f32 %v385_v58, %v373_v2 }
 0x20e   : > { %v484_v5 = vpop.permute.xlu1 %483  ;;  %v387_v8 = vadd.f32 %v385_v58, %v379_v4 }
 0x20f   : > { %v486_v9 = vpop.permute.xlu0 %485  ;;  %v436_v14 = vadd.f32 %v430_v49, %v388_v10 }
 0x210   : > { %v435_v12 = vadd.f32 %v428_v47, %v387_v8  ;;  %v487_v16 = vsel %vm251_vm11, %v484_v5, %v486_v9 }
 0x212   : > { %v490_v11 = vpop.permute.xlu1 %489 }
 0x213   : > { %v492_v13 = vpop.permute.xlu0 %491 }
 0x214   : > { %v493_v19 = vsel %vm366_vm10, %v490_v11, %v492_v13  ;;  %v494_v20 = vsel %vm366_vm10, %v492_v13, %v490_v11  ;;  %v876_v13 = vld [vmem:[%s1452_s3 + $0x2] sm:$0x3] }
 0x215   : > { %v500_v22 = vsel %vm254_vm12, %v487_v16, %v494_v20  ;;  %v501_v23 = vadd.f32 %v493_v19, %v435_v12 }
 0x216   : > { %v502_v24 = vadd.f32 %v500_v22, %v436_v14  ;;  %v879_v14 = vld [vmem:[%s1452_s3 + $0x4] sm:$0x3] }
 0x217   : > { %v503_v25 = vsel %vm306_vm7, %v501_v23, 0.0 }
 0x218   : > { %v504_v26 = vsel %vm306_vm7, %v502_v24, 0.0 }
 0x219   : > { %v505_v27 = vadd.f32 %v504_v26, %v503_v25 }
 0x21b   : > { %506 = vadd.xlane.f32.xlu1 %v505_v27 }
 0x2a8   : > { %v507_v28 = vpop.xlane.xlu1 %506 }
 0x2a9   : > { %v508_v29 = vmul.f32 0.00390625, %v507_v28 }
 0x2ab   : > { %v509_v30 = vsub.f32 %v501_v23, %v508_v29  ;;  %v510_v31 = vsub.f32 %v502_v24, %v508_v29 }
 0x2ad   : > { %v511_v32 = vmul.f32 %v509_v30, %v509_v30  ;;  %v512_v33 = vmul.f32 %v510_v31, %v510_v31 }
 0x2af   : > { %v513_v34 = vsel %vm306_vm7, %v511_v32, 0.0  ;;  %v514_v35 = vsel %vm306_vm7, %v512_v33, 0.0 }
 0x2b0   : > { %v515_v36 = vadd.f32 %v514_v35, %v513_v34 }
 0x2b2   : > { %516 = vadd.xlane.f32.xlu0 %v515_v36 }
 0x33f   : > { %v517_v37 = vpop.xlane.xlu0 %516 }
 0x340   : > { %v518_v38 = vmul.f32 0.00390625, %v517_v37 }
 0x342   : > { %v519_v39 = vadd.f32 1e-05, %v518_v38 }
 0x344   : > { %963 = vrsqrt.f32 %v519_v39 }
 0x34e   : > { %v964_v40 = vpop.eup %963 }
 0x34f   : > { %v521_v41 = vmul.f32 %v964_v40, %v509_v30  ;;  %v522_v42 = vmul.f32 %v964_v40, %v510_v31 }
 0x351   : > { %v523_v43 = vmax.f32 %v521_v41, 0.0  ;;  %v524_v44 = vmax.f32 %v522_v42, 0.0 }
 0x353   : > { %v956_v45 = vpack.i.bf16 %v524_v44, %v523_v43  ;;  %v544_v47 = vpack.c.bf16 %v524_v44, %v524_v44  ;;  %v543_v48 = vpack.c.bf16 %v523_v43, %v523_v43 }
 0x355   : > { %957 = vrot.lane.b32.xlu1 %v956_v45, %s1068_s14  ;;  %952 = vrot.lane.b32.xlu0 %v956_v45, %s1066_s12  ;;  %v550_v55 = vrot.slane %v544_v47, 6  ;;  %v549_v56 = vrot.slane %v543_v48, 6  ;;  %s1003_s12 = scalar_lea.vmem %s1002_s17, 256 }
 0x356   : > { %p1005_p10 = scmp.lt.s32.totalorder %s1003_s12, %s997_s15 }
 0x358   : > { %p1006_p2 = por %p1005_p10, %p1004_p7 }
 0x359   : > { %631 = vperm.xlu1 %950, %v628_v46  }
 0x35a   : > { %p1007_p4 = pnand %p1006_p2, %p1000_p13 }
 0x3c7   : > { %v958_v49 = vpop.permute.xlu1 %957  ;;  %v953_v50 = vpop.permute.xlu0 %952 }
 0x3c8   : > { %v960_v51 = vunpack.i.h.bf16 %v958_v49  ;;  %v959_v52 = vunpack.i.l.bf16 %v958_v49  ;;  %v955_v53 = vunpack.i.h.bf16 %v953_v50  ;;  %v954_v54 = vunpack.i.l.bf16 %v953_v50 }
 0x3ca   : > { %v535_v57 = vsel %vm270_vm2, %v959_v52, %v960_v51  ;;  %v536_v58 = vsel %vm270_vm2, %v960_v51, %v959_v52  ;;  %v529_v59 = vsel %vm263_vm0, %v954_v54, %v955_v53  ;;  %v530_v60 = vsel %vm263_vm0, %v955_v53, %v954_v54 }
 0x3cb   : > { %v537_v61 = vsel %vm1241_vm1, %v535_v57, %v530_v60  ;;  %v538_v62 = vsel %vm1250_vm4, %v536_v58, %v529_v59  ;;  %v539_v63 = vsel %vm1246_vm3, %v530_v60, %v535_v57  ;;  %v540_v1 = vsel %vm1254_vm5, %v529_v59, %v536_v58 }
 0x3cc   : > { %v541_v2 = vpack.c.bf16 %v537_v61, %v537_v61  ;;  %v542_v4 = vpack.c.bf16 %v538_v62, %v538_v62  ;;  %v545_v5 = vpack.c.bf16 %v539_v63, %v539_v63  ;;  %v546_v8 = vpack.c.bf16 %v540_v1, %v540_v1 }
 0x3ce   : > { %v554_v9 = vrot.slane %v546_v8, 4  ;;  %v560_v10 = vsel %vm299_vm6, %v542_v4, %v550_v55  ;;  %v553_v11 = vrot.slane %v545_v5, 4  ;;  %v557_v15 = vsel %vm299_vm6, %v541_v2, %v549_v56 }
 0x3d0   : > { %v564_v12 = vsel %vm306_vm7, %v560_v10, %v554_v9  ;;  %v562_v18 = vsel %vm306_vm7, %v557_v15, %v553_v11 }
 0x3d1   : > { %874 = vmatprep.subr.msk.bf16.mxu1 %vm316_vm8, %v564_v12  ;;  %877 = vmatprep.subr.msk.bf16.mxu0 %vm316_vm8, %v564_v12  ;;  %v569_v17 = vsel %vm316_vm8, %v562_v18, 0 }
 0x3d2   : > { %574 = vmatpush1.bf16.msra.mxu1 %v569_v17  ;;  %642 = vmatpush1.bf16.msra.mxu0 %v569_v17 }
 0x3d3   : > { %880 = vmatprep.subr.msk.bf16.mxu1 %vm316_vm8, %v564_v12 }
 0x3d5   : > { %875 = vmatmul.mubr.msk.bf16.vlgmr.msra.gmra.mrb[4].mxu1 %vm312_vm9, %v565_v21  ;;  %878 = vmatmul.mubr.msk.bf16.vlgmr.msra.gmra.mrb[8].mxu0 %vm312_vm9, %v876_v13 }
 0x3d6   : > { %690 = vmatpush1.bf16.msra.mxu1 %v569_v17  ;;  %721 = vmatprep.mubr.bf16.mxu1 %v1067_v3 }
 0x3d8   : > { %v632_v30 = vpop.permute.xlu1 %631 }
 0x3dd   : > { %881 = vmatmul.mubr.msk.bf16.vlgmr.msra.gmra.mrb[8].mxu1 %vm312_vm9, %v879_v14 }
 0x4a8   : > { %v607_v16 = vpop.f32.mrb[4].mxu1  ;;  %v675_v19 = vpop.f32.mrb[8].mxu0 }
 0x4a9   : > { %v609_v20 = vpop.f32.mrb[5].mxu1  ;;  %614 = vrot.lane.b32.xlu0 %v607_v16, %s1069_s10  ;;  %v677_v22 = vpop.f32.mrb[9].mxu0 }
 0x4aa   : > { %616 = vrot.lane.b32.xlu1 %v609_v20, %s1069_s10  ;;  %v611_v23 = vpop.f32.mrb[6].mxu1  ;;  %v679_v24 = vpop.f32.mrb[10].mxu0 }
 0x4ab   : > { %v612_v25 = vpop.f32.mrb[7].mxu1  ;;  %v680_v26 = vpop.f32.mrb[11].mxu0 }
 0x4ad   : > { %620 = vrot.lane.b32.xlu0 %v607_v16, %s1070_s11 }
 0x4ae   : > { %622 = vrot.lane.b32.xlu1 %v609_v20, %s1070_s11 }
 0x4b0   : > { %v723_v3 = vpop.f32.mrb[8].mxu1 }
 0x4b1   : > { %v725_v27 = vpop.f32.mrb[9].mxu1  ;;  %730 = vrot.lane.b32.xlu0 %v723_v3, %s1070_s11 }
 0x4b2   : > { %732 = vrot.lane.b32.xlu1 %v725_v27, %s1070_s11  ;;  %v727_v28 = vpop.f32.mrb[10].mxu1  ;;  %s1405_s11 = scalar_lea.hbm %s1454_s5, %s888_s28 }
 0x4b3   : > { %v728_v29 = vpop.f32.mrb[11].mxu1 }
 0x4b5   : > { %736 = vrot.lane.b32.xlu0 %v723_v3, %s1069_s10 }
 0x4b6   : > { %738 = vrot.lane.b32.xlu1 %v725_v27, %s1069_s10 }
 0x51b   : > { %v615_v31 = vpop.permute.xlu0 %614 }
 0x51c   : > { %v617_v32 = vpop.permute.xlu1 %616 }
 0x51d   : > { %v618_v35 = vsel %vm366_vm10, %v615_v31, %v617_v32 }
 0x51f   : > { %v621_v33 = vpop.permute.xlu0 %620 }
 0x520   : > { %v623_v34 = vpop.permute.xlu1 %622 }
 0x521   : > { %v625_v36 = vsel %vm251_vm11, %v623_v34, %v621_v33  ;;  %v624_v37 = vsel %vm251_vm11, %v621_v33, %v623_v34 }
 0x522   : > { %v626_v38 = vsel %vm251_vm11, %v618_v35, %v625_v36  ;;  %v635_v42 = vadd.f32 %v632_v30, %v624_v37 }
 0x523   : > { %v731_v39 = vpop.permute.xlu0 %730  ;;  %v634_v40 = vadd.f32 %v632_v30, %v626_v38 }
 0x524   : > { %v733_v41 = vpop.permute.xlu1 %732  ;;  %v683_v46 = vadd.f32 %v677_v22, %v635_v42 }
 0x525   : > { %v682_v44 = vadd.f32 %v675_v19, %v634_v40  ;;  %v734_v47 = vsel %vm251_vm11, %v731_v39, %v733_v41 }
 0x527   : > { %v737_v43 = vpop.permute.xlu0 %736 }
 0x528   : > { %v739_v45 = vpop.permute.xlu1 %738 }
 0x529   : > { %v740_v48 = vsel %vm366_vm10, %v737_v43, %v739_v45  ;;  %v741_v49 = vsel %vm366_vm10, %v739_v45, %v737_v43 }
 0x52a   : > { %v743_v50 = vsel %vm254_vm12, %v734_v47, %v741_v49  ;;  %v744_v51 = vadd.f32 %v740_v48, %v682_v44 }
 0x52b   : > { %v745_v52 = vadd.f32 %v743_v50, %v683_v46 }
 0x52c   : > { %v746_v53 = vsel %vm306_vm7, %v744_v51, 0.0 }
 0x52d   : > { %v747_v54 = vsel %vm306_vm7, %v745_v52, 0.0 }
 0x52e   : > { %v748_v55 = vadd.f32 %v747_v54, %v746_v53 }
 0x530   : > { %749 = vadd.xlane.f32.xlu0 %v748_v55 }
 0x5bd   : > { %v750_v56 = vpop.xlane.xlu0 %749 }
 0x5be   : > { %v751_v57 = vmul.f32 0.00390625, %v750_v56 }
 0x5c0   : > { %v752_v58 = vsub.f32 %v744_v51, %v751_v57  ;;  %v753_v59 = vsub.f32 %v745_v52, %v751_v57 }
 0x5c2   : > { %v754_v60 = vmul.f32 %v752_v58, %v752_v58  ;;  %v755_v6 = vmul.f32 %v753_v59, %v753_v59 }
 0x5c4   : > { %v756_v61 = vsel %vm306_vm7, %v754_v60, 0.0  ;;  %v757_v7 = vsel %vm306_vm7, %v755_v6, 0.0 }
 0x5c5   : > { %v758_v62 = vadd.f32 %v757_v7, %v756_v61 }
 0x5c7   : > { %759 = vadd.xlane.f32.xlu1 %v758_v62 }
 0x654   : > { %v760_v63 = vpop.xlane.xlu1 %759 }
 0x655   : > { %v761_v1 = vmul.f32 0.00390625, %v760_v63 }
 0x657   : > { %v762_v2 = vadd.f32 1e-05, %v761_v1 }
 0x659   : > { %965 = vrsqrt.f32 %v762_v2 }
 0x663   : > { %v966_v4 = vpop.eup %965 }
 0x664   : > { %v764_v5 = vmul.f32 %v966_v4, %v752_v58  ;;  %v765_v8 = vmul.f32 %v966_v4, %v753_v59 }
 0x666   : > { %v768_v9 = vcombine.low %v764_v5, %v765_v8 }
 0x668   : > { %v770_v10 = vadd.f32 %v768_v9, %v1217_v0 }
 0x66a   : > { %771 = vst [vmem:[%s240_s8] sm:$0xff] %v770_v10 }
 0x66b   : > { %1010 = shalt.err (!%p1007_p4)
}
 0x66c   : > { %s1011_s13 = scalar_lea.hbm %s1405_s11, 128  ;;  %s1015_s16 = scalar_lea.hbm %s1454_s5, 256 }
 0x66d   : > { %p1012_p5 = scmp.ne.s32.totalorder %s1405_s11, %s1011_s13  ;;  %p1016_p0 = scmp.lt.u32.totalorder %s1405_s11, %s1454_s5 }
 0x66e   : > { %p1017_p1 = scmp.lt.u32.totalorder %s1015_s16, %s1011_s13  ;;  %p1019_p6 = scmp.lt.u32.totalorder %s1011_s13, %s1405_s11 }
 0x66f   : > { %p1013_p8 = pnand %p1012_p5, %p1471_p11 }
 0x670   : > { %p1018_p3 = por %p1017_p1, %p1016_p0 }
 0x671   : > { %p1014_p9 = pneg %p1013_p8 }
 0x672   : > { %p1020_p12 = por %p1019_p6, %p1018_p3 }
 0x674   : > { %p1021_p13 = pnand %p1020_p12, %p1014_p9 }
 0x676   : > { %1024 = shalt.err (!%p1021_p13)
}
 0x677   : > { %891 = dma.vmem_to_hbm [thread:$0]  (%p1471_p11), %s1407_s7, 128, %s1405_s11, %s773_s23  }
 0x678 PF: > { %s799_s28 = sand.u32 1, %s1051_s18   ;;  %p1472_p7 = scmp.ne.s32.totalorder %s1459_s6, 0 }
 0x679   : > { %p1473_p10 = scmp.ge.s32.totalorder %s1063_s21, 2  ;;  %s800_s8 = scalar_lea.sflag [#allocation4], %s799_s28 }
 0x67b   : > { %p898_p2 = pnand %p1473_p10, %p1472_p7 }
 0x67d   : > { %1046 = dma.done.wait (!%p898_p2), %s800_s8, 128  }
 0x67e   : > { %1048 = vsyncadd (!%p898_p2), %s800_s8, 4294967168  ;;  %p18_p4 = scmp.ge.s32.totalorder %s1127_s24, 4   ;;  %s1474_s18 = smov %s1055_s19 }
 0x67f   : > { %s1475_s19 = smov %s1059_s20  ;;  %s1476_s20 = smov %s1139_s27 }
 0x680   : > { %s1477_s21 = smov %s1127_s24  ;;  %20 = sbr.rel (!%p18_p4) target bundleno = 5 (0x5), region = 89 }
 0x687   :  { %805 = vsyncpa [#allocation3], 1 }
 0x688   :  { %807 = vsyncpa [#allocation3 + $0x1], 1 }
 0x689   :  { %808 = vsyncpa [#allocation4], 1 }
 0x68a   :  { %810 = vsyncpa [#allocation4 + $0x1], 1 }

</bundles_post_ra>
